<compile_context>
chip_gen: v6e
topology: v6e:2x2x1
jax: 0.10.0
libtpu: 0.0.40
codegen_flags: <defaults>
</compile_context>

<pallas_src>
import functools

import jax
import jax.numpy as jnp
from jax.experimental import pallas as pl
from jax.experimental.pallas import tpu as pltpu

_CLAMP_MIN = 1e-6
_CLAMP_MAX = 1e6
_LANES = 128
_MAX_TILE_ROWS = 2048  # ~1 MiB f32 tiles in the folded path


def _logvar_folded_kernel(x_ref, selm_ref, selc_ref, o_ref, *, t):
    """Folded path: each 128-lane row of x holds F = 128 // t original rows.

    selm (128, 128): x @ selm = per-segment mean broadcast over the segment.
    selc (128, F):   y @ selc = per-segment sums compacted to F lanes.
    """
    x = x_ref[...].astype(jnp.float32)                       # (TILE_G, 128)
    mean_b = jnp.dot(x, selm_ref[...],
                     preferred_element_type=jnp.float32)     # (TILE_G, 128)
    d = x - mean_b
    ss = jnp.dot(d * d, selc_ref[...],
                 preferred_element_type=jnp.float32)         # (TILE_G, F)
    var = ss * (1.0 / (t - 1))                               # unbiased (N-1)
    var = jnp.clip(var, _CLAMP_MIN, _CLAMP_MAX)
    o_ref[...] = jnp.log(var).astype(o_ref.dtype)


def _logvar_rows_kernel(x_ref, o_ref):
    """Fallback path: (TILE_R, T) tile, reduce over the lane (last) axis."""
    x = x_ref[...].astype(jnp.float32)
    t = x.shape[-1]
    mean = jnp.mean(x, axis=-1, keepdims=True)
    d = x - mean
    var = jnp.sum(d * d, axis=-1, keepdims=True) * (1.0 / (t - 1))
    var = jnp.clip(var, _CLAMP_MIN, _CLAMP_MAX)
    o_ref[...] = jnp.log(var).astype(o_ref.dtype)


def _folded_call(x2d, t):
    r, _ = x2d.shape
    f = _LANES // t               # original rows per 128-lane row
    g = r // f                    # folded row count
    xf = x2d.reshape(g, _LANES)   # free row-major reinterpretation

    # Constant selection matrices (stay VMEM-resident: constant block index).
    lane = jnp.arange(_LANES, dtype=jnp.int32)
    seg = lane // t
    selm = (seg[:, None] == seg[None, :]).astype(jnp.float32) * (1.0 / t)
    selc = (seg[:, None]
            == jnp.arange(f, dtype=jnp.int32)[None, :]).astype(jnp.float32)

    tile_g = g if g <= _MAX_TILE_ROWS else _MAX_TILE_ROWS
    grid = (pl.cdiv(g, tile_g),)

    itemsize = x2d.dtype.itemsize
    out = pl.pallas_call(
        functools.partial(_logvar_folded_kernel, t=t),
        out_shape=jax.ShapeDtypeStruct((g, f), x2d.dtype),
        grid=grid,
        in_specs=[
            pl.BlockSpec((tile_g, _LANES), lambda i: (i, 0)),
            pl.BlockSpec((_LANES, _LANES), lambda i: (0, 0)),
            pl.BlockSpec((_LANES, f), lambda i: (0, 0)),
        ],
        out_specs=pl.BlockSpec((tile_g, f), lambda i: (i, 0)),
        compiler_params=pltpu.CompilerParams(
            dimension_semantics=("parallel",)),
        cost_estimate=pl.CostEstimate(
            flops=int(2 * g * _LANES * (_LANES + f) + 4 * r * t),
            transcendentals=int(r),
            bytes_accessed=int(r * t * itemsize + r * itemsize
                               + (_LANES * _LANES + _LANES * f) * 4),
        ),
    )(xf, selm, selc)
    return out.reshape(r)


def _rows_call(x2d):
    r, t = x2d.shape
    # Size tiles to ~1 MiB so double-buffering fits every generation's default
    # scoped VMEM (16 MiB on v5e is the tightest).
    bytes_per_row = t * 4
    max_rows = max(8, ((1 << 20) // bytes_per_row) // 8 * 8)
    tile_r = min(r, _MAX_TILE_ROWS, max_rows)
    if tile_r < r:
        tile_r = max(8, (tile_r // 8) * 8)
    grid = (pl.cdiv(r, tile_r),)

    itemsize = x2d.dtype.itemsize
    out = pl.pallas_call(
        _logvar_rows_kernel,
        out_shape=jax.ShapeDtypeStruct((r, 1), x2d.dtype),
        grid=grid,
        in_specs=[pl.BlockSpec((tile_r, t), lambda i: (i, 0))],
        out_specs=pl.BlockSpec((tile_r, 1), lambda i: (i, 0)),
        compiler_params=pltpu.CompilerParams(
            dimension_semantics=("parallel",)),
        cost_estimate=pl.CostEstimate(
            flops=int(4 * r * t),
            transcendentals=int(r),
            bytes_accessed=int(r * t * itemsize + r * itemsize),
        ),
    )(x2d)
    return out.reshape(r)


def log_var_layer(x, dim=3):
    """Pallas forward of LogVarLayer: log(clamp(var(x, dim, unbiased), 1e-6, 1e6)).

    `dim` must address the last axis (the lightconvnet usage, dim=3); that axis
    is reduced with the unbiased (N-1) estimator and squeezed. Works for f32 or
    bf16 inputs (accumulation is always f32 inside the kernel).
    """
    if dim < 0:
        dim += x.ndim
    assert dim == x.ndim - 1, "kernel implements reduction over the last axis"
    t = x.shape[-1]
    # TODO(synk): torch returns NaN for T == 1 (0/0 in the unbiased estimator);
    # that degenerate case is not reproduced here.
    assert t >= 2, "unbiased variance needs at least 2 samples along `dim`"

    lead_shape = x.shape[:-1]
    r = 1
    for s in lead_shape:
        r *= s
    x2d = x.reshape(r, t)

    if t < _LANES and _LANES % t == 0 and r % (_LANES // t) == 0:
        out = _folded_call(x2d, t)
    else:
        out = _rows_call(x2d)
    return out.reshape(lead_shape)


def _reference(x, dim=3):
    # Pure-JAX reference matching torch semantics (unbiased var, clamp, log).
    var = jnp.var(x.astype(jnp.float32), axis=dim, ddof=1)
    return jnp.log(jnp.clip(var, _CLAMP_MIN, _CLAMP_MAX)).astype(x.dtype)


if __name__ == "__main__":
    key = jax.random.PRNGKey(0)
    k1, k2 = jax.random.split(key)

    # Shape consistent with lightconvnet usage: (batch, bands*m, strideFactor, T).
    B, C, S, T = 2, 4, 16, 16
    # Non-zero mean exercises the mean-subtraction (two-pass) path.
    x = jax.random.normal(k1, (B, C, S, T), dtype=jnp.float32) * 0.7 + 0.3

    out = jax.block_until_ready(log_var_layer(x, dim=3))
    ref = _reference(x, dim=3)
    assert out.shape == (B, C, S)
    # Loose-ish tolerance: the folded path reduces on the MXU, whose internal
    # product precision for f32 can be slightly below pure-VPU f32.
    assert jnp.allclose(out, ref, atol=5e-3, rtol=5e-3), \
        float(jnp.max(jnp.abs(out - ref)))

    # Also exercise the generic fallback (T does not fold into 128 lanes).
    x2 = jax.random.normal(k2, (2, 3, 4, 200), dtype=jnp.float32)
    out2 = jax.block_until_ready(log_var_layer(x2, dim=3))
    ref2 = _reference(x2, dim=3)
    assert out2.shape == (2, 3, 4)
    assert jnp.allclose(out2, ref2, atol=5e-3, rtol=5e-3), \
        float(jnp.max(jnp.abs(out2 - ref2)))

    print("KERNEL_OK")
</pallas_src>

<mosaic_0001>
module attributes {stable_mosaic.version = 11 : i64} {
  func.func @_logvar_folded_kernel(%arg0: i32, %arg1: memref<16x128xf32, #tpu.memory_space<vmem>>, %arg2: memref<128x128xf32, #tpu.memory_space<vmem>>, %arg3: memref<128x8xf32, #tpu.memory_space<vmem>>, %arg4: memref<16x8xf32, #tpu.memory_space<vmem>>) attributes {dimension_semantics = [#tpu.dimension_semantics<parallel>], iteration_bounds = array<i64: 1>, scalar_prefetch = 0 : i64, scratch_operands = 0 : i64, tpu.core_type = #tpu.core_type<tc>, window_params = [{transform_indices = @transform_0, window_bounds = array<i64: 16, 128>}, {pipeline_mode = #tpu.pipeline_mode<synchronous>, transform_indices = @transform_1, window_bounds = array<i64: 128, 128>}, {pipeline_mode = #tpu.pipeline_mode<synchronous>, transform_indices = @transform_2, window_bounds = array<i64: 128, 8>}, {transform_indices = @transform_3, window_bounds = array<i64: 16, 8>}]} {
    %c0 = arith.constant 0 : index
    %c0_0 = arith.constant 0 : index
    %0 = vector.load %arg1[%c0, %c0_0] : memref<16x128xf32, #tpu.memory_space<vmem>>, vector<16x128xf32>
    %c0_1 = arith.constant 0 : index
    %c0_2 = arith.constant 0 : index
    %1 = vector.load %arg2[%c0_1, %c0_2] : memref<128x128xf32, #tpu.memory_space<vmem>>, vector<128x128xf32>
    %cst = arith.constant dense<0.000000e+00> : vector<16x128xf32>
    %2 = tpu.matmul %0, %1, %cst {dimension_numbers = #tpu.dot_dimension_numbers<[1], [0], [0], [1], [0, 0, 1, 1], [], []>} : vector<16x128xf32>, vector<128x128xf32>, vector<16x128xf32> -> vector<16x128xf32>
    %3 = arith.subf %0, %2 : vector<16x128xf32>
    %4 = arith.mulf %3, %3 : vector<16x128xf32>
    %c0_3 = arith.constant 0 : index
    %c0_4 = arith.constant 0 : index
    %5 = vector.load %arg3[%c0_3, %c0_4] : memref<128x8xf32, #tpu.memory_space<vmem>>, vector<128x8xf32>
    %cst_5 = arith.constant dense<0.000000e+00> : vector<16x8xf32>
    %6 = tpu.matmul %4, %5, %cst_5 {dimension_numbers = #tpu.dot_dimension_numbers<[1], [0], [0], [1], [0, 0, 1, 1], [], []>} : vector<16x128xf32>, vector<128x8xf32>, vector<16x8xf32> -> vector<16x8xf32>
    %cst_6 = arith.constant 0.0666666701 : f32
    %7 = vector.broadcast %cst_6 : f32 to vector<16x8xf32>
    %8 = arith.mulf %6, %7 : vector<16x8xf32>
    %cst_7 = arith.constant 9.99999997E-7 : f32
    %cst_8 = arith.constant 1.000000e+06 : f32
    %9 = vector.broadcast %cst_7 : f32 to vector<16x8xf32>
    %10 = arith.maximumf %9, %8 : vector<16x8xf32>
    %11 = vector.broadcast %cst_8 : f32 to vector<16x8xf32>
    %12 = arith.minimumf %11, %10 : vector<16x8xf32>
    %13 = math.log %12 : vector<16x8xf32>
    %c0_9 = arith.constant 0 : index
    %c0_10 = arith.constant 0 : index
    %14 = vector.load %arg4[%c0_9, %c0_10] : memref<16x8xf32, #tpu.memory_space<vmem>>, vector<16x8xf32>
    tpu.vector_store %arg4[%c0_9, %c0_10], %13 {strides = array<i32>} : memref<16x8xf32, #tpu.memory_space<vmem>>, vector<16x8xf32>,
    return
  }
  func.func @transform_0(%arg0: i32) -> (i32, i32) {
    %c0_i32 = arith.constant 0 : i32
    %c0_i32_0 = arith.constant 0 : i32
    return %arg0, %c0_i32 : i32, i32
  }
  func.func @transform_1(%arg0: i32) -> (i32, i32) {
    %c0_i32 = arith.constant 0 : i32
    %c0_i32_0 = arith.constant 0 : i32
    %c0_i32_1 = arith.constant 0 : i32
    return %c0_i32, %c0_i32_0 : i32, i32
  }
  func.func @transform_2(%arg0: i32) -> (i32, i32) {
    %c0_i32 = arith.constant 0 : i32
    %c0_i32_0 = arith.constant 0 : i32
    %c0_i32_1 = arith.constant 0 : i32
    return %c0_i32, %c0_i32_0 : i32, i32
  }
  func.func @transform_3(%arg0: i32) -> (i32, i32) {
    %c0_i32 = arith.constant 0 : i32
    %c0_i32_0 = arith.constant 0 : i32
    return %arg0, %c0_i32 : i32, i32
  }
}

</mosaic_0001>

<bundles_post_ra>
// kernel: tpu_custom_call.1
= control target key start
LH: loop header
LB: loop body
LE: loop exit
PB: predicated region body
PF: predicated region fallthrough
CT: control target
= control target key end

     0   :  { %8 = vsyncpa [#allocation3], 0  ;;  %s369_s12 = smov [#allocation2]   ;;  %s501_s0 = inlined_call_operand.hbm [shape: f32[16,128], index: 0, kind: input, shape index: {}]   ;;  %s502_s1 = inlined_call_operand.vmem [shape: f32[128,128], index: 1, kind: input, shape index: {}]   ;;  %s503_s2 = inlined_call_operand.vmem [shape: f32[128,8], index: 2, kind: input, shape index: {}]   ;;  %s504_s3 = inlined_call_operand.vmem [shape: f32[16,8], index: 3, kind: output, shape index: {}]  }
   0x1   :  { %s14_s13 = sshll.u32 %s369_s12, 4  ;;  %s15_s13 = int_to_ptr.vmem [resolvable:$true] %s14_s13 }
   0x2   :  { %s355_s14 = scalar_lea.vmem %s15_s13, 256  ;;  %p360_p1 = scmp.lt.s32.totalorder %s15_s13, %s15_s13 }
   0x3   :  { %p356_p0 = scmp.ne.s32.totalorder %s15_s13, %s355_s14  ;;  %p361_p2 = scmp.lt.s32.totalorder %s355_s14, %s355_s14 }
   0x5   :  { %p362_p3 = por %p361_p2, %p360_p1 }
   0x7   :  { %p363_p4 = pnand %p362_p3, %p356_p0 }
   0x9   :  { %366 = shalt.err (!%p363_p4)
}
   0xa   :  { %s370_s15 = smov 128   ;;  %s371_s16 = smov 8  }
   0xb   :  { %20 = dma.hbm_to_vmem [thread:$0]  %s501_s0, 256, %s15_s13, [#allocation3], %s370_s15, %s370_s15, %s371_s16  }
   0xc   :  { %367 = dma.done.wait [#allocation3], 256  }
   0xd   :  { %368 = vsyncadd [#allocation3], 4294967040  ;;  %v45_v0 = vld [vmem:[%s502_s1 + $0x78] sm:$0xff]  ;;  %v44_v1 = vld [vmem:[%s502_s1 + $0x70] sm:$0xff]  ;;  %vm226_vm0 = vcmask 64512  }
   0xe   :  { %270 = vmatprep.subr.mxu0 %v45_v0  ;;  %v43_v2 = vld [vmem:[%s502_s1 + $0x68] sm:$0xff]  ;;  %v42_v3 = vld [vmem:[%s502_s1 + $0x60] sm:$0xff]  ;;  %v41_v5 = vld [vmem:[%s502_s1 + $0x58] sm:$0xff] }
   0xf   :  { %271 = vmatpush3.msra.mxu0 %v45_v0  ;;  %v407_v4 = vld [vmem:[#allocation2] sm:$0xff]  ;;  %v140_v6 = vld [vmem:[%s503_s2 + $0x78] sm:$0xff]  ;;  %v139_v7 = vld [vmem:[%s503_s2 + $0x70] sm:$0xff] }
  0x10   :  { %272 = vmatprep.subr.mxu0 %v44_v1  ;;  %302 = vmatprep.mubr.f32.mxu0 %v407_v4  ;;  %v40_v8 = vld [vmem:[%s502_s1 + $0x50] sm:$0xff]  ;;  %v138_v9 = vld [vmem:[%s503_s2 + $0x68] sm:$0xff]  ;;  %v137_v11 = vld [vmem:[%s503_s2 + $0x60] sm:$0xff] }
  0x11   :  { %273 = vmatpush3.msra.mxu0 %v44_v1  ;;  %305 = vmatprep.subr.mxu1 %v140_v6  ;;  %v39_v10 = vld [vmem:[%s502_s1 + $0x48] sm:$0xff]  ;;  %v38_v12 = vld [vmem:[%s502_s1 + $0x40] sm:$0xff]  ;;  %v136_v13 = vld [vmem:[%s503_s2 + $0x58] sm:$0xff] }
  0x12   :  { %274 = vmatprep.subr.mxu0 %v43_v2  ;;  %306 = vmatpush3.msra.mxu1 %v140_v6  ;;  %v37_v14 = vld [vmem:[%s502_s1 + $0x38] sm:$0xff]  ;;  %v135_v15 = vld [vmem:[%s503_s2 + $0x50] sm:$0xff]  ;;  %v134_v17 = vld [vmem:[%s503_s2 + $0x48] sm:$0xff] }
  0x13   :  { %275 = vmatpush3.msra.mxu0 %v43_v2  ;;  %307 = vmatprep.subr.mxu1 %v139_v7  ;;  %v36_v16 = vld [vmem:[%s502_s1 + $0x30] sm:$0xff]  ;;  %v35_v18 = vld [vmem:[%s502_s1 + $0x28] sm:$0xff]  ;;  %v133_v19 = vld [vmem:[%s503_s2 + $0x40] sm:$0xff] }
  0x14   :  { %276 = vmatprep.subr.mxu0 %v42_v3  ;;  %308 = vmatpush3.msra.mxu1 %v139_v7  ;;  %v34_v20 = vld [vmem:[%s502_s1 + $0x20] sm:$0xff]  ;;  %v132_v21 = vld [vmem:[%s503_s2 + $0x38] sm:$0xff]  ;;  %v131_v23 = vld [vmem:[%s503_s2 + $0x30] sm:$0xff] }
  0x15   :  { %277 = vmatpush3.msra.mxu0 %v42_v3  ;;  %309 = vmatprep.subr.mxu1 %v138_v9  ;;  %v33_v22 = vld [vmem:[%s502_s1 + $0x18] sm:$0xff]  ;;  %v32_v24 = vld [vmem:[%s502_s1 + $0x10] sm:$0xff]  ;;  %v130_v25 = vld [vmem:[%s503_s2 + $0x28] sm:$0xff] }
  0x16   :  { %278 = vmatprep.subr.mxu0 %v41_v5  ;;  %310 = vmatpush3.msra.mxu1 %v138_v9  ;;  %v31_v26 = vld [vmem:[%s502_s1 + $0x8] sm:$0xff]  ;;  %v129_v27 = vld [vmem:[%s503_s2 + $0x20] sm:$0xff]  ;;  %v128_v30 = vld [vmem:[%s503_s2 + $0x18] sm:$0xff] }
  0x17   :  { %279 = vmatpush3.msra.mxu0 %v41_v5  ;;  %311 = vmatprep.subr.mxu1 %v137_v11  ;;  %v30_v28 = vld [vmem:[%s502_s1] sm:$0xff]  ;;  %v29_v29 = vld [vmem:[#allocation2 + $0x8] sm:$0xff]  ;;  %v127_v31 = vld [vmem:[%s503_s2 + $0x10] sm:$0xff] }
  0x18   :  { %280 = vmatprep.subr.mxu0 %v40_v8  ;;  %312 = vmatpush3.msra.mxu1 %v137_v11  ;;  %v126_v32 = vld [vmem:[%s503_s2 + $0x8] sm:$0xff]  ;;  %v125_v33 = vld [vmem:[%s503_s2] sm:$0xff] }
  0x19   :  { %281 = vmatpush3.msra.mxu0 %v40_v8  ;;  %313 = vmatprep.subr.mxu1 %v136_v13 }
  0x1a   :  { %282 = vmatprep.subr.mxu0 %v39_v10  ;;  %314 = vmatpush3.msra.mxu1 %v136_v13 }
  0x1b   :  { %283 = vmatpush3.msra.mxu0 %v39_v10  ;;  %315 = vmatprep.subr.mxu1 %v135_v15 }
  0x1c   :  { %284 = vmatprep.subr.mxu0 %v38_v12  ;;  %316 = vmatpush3.msra.mxu1 %v135_v15 }
  0x1d   :  { %285 = vmatpush3.msra.mxu0 %v38_v12  ;;  %317 = vmatprep.subr.mxu1 %v134_v17 }
  0x1e   :  { %286 = vmatprep.subr.mxu0 %v37_v14  ;;  %318 = vmatpush3.msra.mxu1 %v134_v17 }
  0x1f   :  { %287 = vmatpush3.msra.mxu0 %v37_v14  ;;  %319 = vmatprep.subr.mxu1 %v133_v19 }
  0x20   :  { %288 = vmatprep.subr.mxu0 %v36_v16  ;;  %320 = vmatpush3.msra.mxu1 %v133_v19 }
  0x21   :  { %289 = vmatpush3.msra.mxu0 %v36_v16  ;;  %321 = vmatprep.subr.mxu1 %v132_v21 }
  0x22   :  { %290 = vmatprep.subr.mxu0 %v35_v18  ;;  %322 = vmatpush3.msra.mxu1 %v132_v21 }
  0x23   :  { %291 = vmatpush3.msra.mxu0 %v35_v18  ;;  %323 = vmatprep.subr.mxu1 %v131_v23 }
  0x24   :  { %292 = vmatprep.subr.mxu0 %v34_v20  ;;  %324 = vmatpush3.msra.mxu1 %v131_v23 }
  0x25   :  { %293 = vmatpush3.msra.mxu0 %v34_v20  ;;  %325 = vmatprep.subr.mxu1 %v130_v25 }
  0x26   :  { %294 = vmatprep.subr.mxu0 %v33_v22  ;;  %326 = vmatpush3.msra.mxu1 %v130_v25 }
  0x27   :  { %295 = vmatpush3.msra.mxu0 %v33_v22  ;;  %327 = vmatprep.subr.mxu1 %v129_v27 }
  0x28   :  { %296 = vmatprep.subr.mxu0 %v32_v24  ;;  %328 = vmatpush3.msra.mxu1 %v129_v27 }
  0x29   :  { %297 = vmatpush3.msra.mxu0 %v32_v24  ;;  %329 = vmatprep.subr.mxu1 %v128_v30 }
  0x2a   :  { %298 = vmatprep.subr.mxu0 %v31_v26  ;;  %330 = vmatpush3.msra.mxu1 %v128_v30 }
  0x2b   :  { %299 = vmatpush3.msra.mxu0 %v31_v26  ;;  %331 = vmatprep.subr.mxu1 %v127_v31 }
  0x2c   :  { %300 = vmatprep.subr.mxu0 %v30_v28  ;;  %332 = vmatpush3.msra.mxu1 %v127_v31 }
  0x2d   :  { %301 = vmatpush3.msra.mxu0 %v30_v28  ;;  %333 = vmatprep.subr.mxu1 %v126_v32 }
  0x2e   :  { %303 = vmatmul.mubr.f32.vlgmr.msra.gmra.mxu0 %v29_v29  ;;  %334 = vmatpush3.msra.mxu1 %v126_v32 }
  0x2f   :  { %335 = vmatprep.subr.mxu1 %v125_v33 }
  0x30   :  { %336 = vmatpush3.msra.mxu1 %v125_v33 }
  0xee   :  { %v304_v34 = vpop.f32.mrf.mxu0 }
  0xef   :  { %v122_v35 = vsub.f32 %v29_v29, %v304_v34 }
  0xf0   :  { %v112_v36 = vpop.f32.mrf.mxu0 }
  0xf1   :  { %v121_v37 = vsub.f32 %v407_v4, %v112_v36  ;;  %v124_v39 = vmul.f32 %v122_v35, %v122_v35 }
  0xf3   :  { %v123_v38 = vmul.f32 %v121_v37, %v121_v37 }
  0xf5   :  { %337 = vmatprep.mubr.f32.mxu1 %v123_v38 }
  0xf6   :  { %338 = vmatmul.mubr.f32.vlgmr.msra.gmra.mxu1 %v124_v39 }
 0x1b6   :  { %v339_v40 = vpop.f32.mrf.mxu1 }
 0x1b7   :  { %v217_v41 = vmul.f32 0.06666667, %v339_v40 }
 0x1b8   :  { %v207_v42 = vpop.f32.mrf.mxu1 }
 0x1b9   :  { %v219_v43 = vmax.f32 %v217_v41, 1e-06  ;;  %v216_v44 = vmul.f32 0.06666667, %v207_v42 }
 0x1bb   :  { %v221_v45 = vmin.f32 %v219_v43, 1000000.0  ;;  %v218_v46 = vmax.f32 %v216_v44, 1e-06 }
 0x1bd   :  { %343 = vlog2.f32 %v221_v45  ;;  %v220_v47 = vmin.f32 %v218_v46, 1000000.0 }
 0x1bf   :  { %345 = vlog2.f32 %v220_v47 }
 0x1ca   :  { %v344_v48 = vpop.eup %343 }
 0x1cb   :  { %v225_v49 = vmul.f32 0.6931472, %v344_v48 }
 0x1cc   :  { %v346_v50 = vpop.eup %345 }
 0x1cd   :  { %228 = vst.msk [vmem:[%s504_s3 + $0x8] sm:$0xff] %vm226_vm0, %v225_v49  ;;  %v223_v51 = vmul.f32 0.6931472, %v346_v50 }
 0x1cf   :  { %227 = vst.msk [vmem:[%s504_s3] sm:$0xff] %vm226_vm0, %v223_v51 }
 0x1d0   :  { %233 = vsyncpa [#allocation3], 1 }

</bundles_post_ra>
